<compile_context>
chip_gen: v7x
topology: tpu7x:2x2x1
jax: 0.10.0
libtpu: 0.0.40
codegen_flags: <defaults>
</compile_context>

<pallas_src>
import jax
import jax.numpy as jnp
from jax.experimental import pallas as pl
from jax.experimental.pallas import tpu as pltpu

IN_DIM = 42
H_DIM = 128
OUT_DIM = 9
PAD_IN = 128    # 42 -> 128 lane-aligned features
PAD_OUT = 128   # 9  -> 128 lane-dense output
TB = 256        # batch tile (MXU-friendly height, multiple of 8 sublanes)


def dqn_kernel(x_ref, w1_ref, b1_ref, w2_ref, b2_ref, w3_ref, b3_ref, o_ref):
    # x_ref: (TB, PAD_IN) bf16; weights bf16; biases f32; o_ref: (TB, PAD_OUT) f32
    x = x_ref[...]

    h1 = jnp.dot(x, w1_ref[...], preferred_element_type=jnp.float32) + b1_ref[...]
    h1 = jnp.maximum(h1, 0.0)                       # f32 bias-add / ReLU (v5e VPU safe)

    h2 = jnp.dot(h1.astype(jnp.bfloat16), w2_ref[...],
                 preferred_element_type=jnp.float32) + b2_ref[...]
    h2 = jnp.maximum(h2, 0.0)

    out = jnp.dot(h2.astype(jnp.bfloat16), w3_ref[...],
                  preferred_element_type=jnp.float32) + b3_ref[...]
    o_ref[...] = out                                 # lane-dense (TB, 128) f32 store


def dqn_forward(x, params):
    """x: (B, 42) f32.  params: f32 (in,out)-layout weights/biases.  Returns (B, 9) f32."""
    w1, b1, w2, b2, w3, b3 = params
    B = x.shape[0]

    # ---- wrapper-side layout prep (padding + bf16 cast) ----
    n_blocks = pl.cdiv(B, TB)
    B_pad = n_blocks * TB

    x_p = jnp.zeros((B_pad, PAD_IN), jnp.bfloat16)
    x_p = x_p.at[:B, :IN_DIM].set(x.astype(jnp.bfloat16))

    w1_p = jnp.zeros((PAD_IN, H_DIM), jnp.bfloat16).at[:IN_DIM, :].set(
        w1.astype(jnp.bfloat16))
    w2_p = w2.astype(jnp.bfloat16)
    w3_p = jnp.zeros((H_DIM, PAD_OUT), jnp.bfloat16).at[:, :OUT_DIM].set(
        w3.astype(jnp.bfloat16))

    b1_p = b1.astype(jnp.float32)                                    # (1, 128)
    b2_p = b2.astype(jnp.float32)                                    # (1, 128)
    b3_p = jnp.zeros((1, PAD_OUT), jnp.float32).at[:, :OUT_DIM].set(
        b3.astype(jnp.float32))                                      # (1, 128)

    # ---- BlockSpecs: batch-tiled x/out, resident weights ----
    x_spec = pl.BlockSpec((TB, PAD_IN), lambda i: (i, 0))
    o_spec = pl.BlockSpec((TB, PAD_OUT), lambda i: (i, 0))
    resident = lambda shape: pl.BlockSpec(shape, lambda i: (0, 0))

    out_padded = pl.pallas_call(
        dqn_kernel,
        out_shape=jax.ShapeDtypeStruct((B_pad, PAD_OUT), jnp.float32),
        grid=(n_blocks,),
        in_specs=[
            x_spec,
            resident(w1_p.shape),
            resident(b1_p.shape),
            resident(w2_p.shape),
            resident(b2_p.shape),
            resident(w3_p.shape),
            resident(b3_p.shape),
        ],
        out_specs=o_spec,
        compiler_params=pltpu.CompilerParams(
            dimension_semantics=("parallel",),      # use both TCs on v7x
        ),
    )(x_p, w1_p, b1_p, w2_p, b2_p, w3_p, b3_p)

    return out_padded[:B, :OUT_DIM]


def init_params(key):
    """Deterministic init mimicking PyTorch nn.Linear default U[-1/sqrt(fan_in), +1/sqrt(fan_in)]."""
    def linear(key, fan_in, fan_out):
        kw, kb = jax.random.split(key)
        bound = 1.0 / jnp.sqrt(jnp.float32(fan_in))
        w = jax.random.uniform(kw, (fan_in, fan_out), jnp.float32, -bound, bound)
        b = jax.random.uniform(kb, (1, fan_out), jnp.float32, -bound, bound)
        return w, b

    k1, k2, k3 = jax.random.split(key, 3)
    w1, b1 = linear(k1, IN_DIM, H_DIM)
    w2, b2 = linear(k2, H_DIM, H_DIM)
    w3, b3 = linear(k3, H_DIM, OUT_DIM)
    return (w1, b1, w2, b2, w3, b3)


def reference_forward(x, params):
    """Pure-JAX reference using the same bf16-operand / f32-accumulate numeric path."""
    w1, b1, w2, b2, w3, b3 = params
    xb = x.astype(jnp.bfloat16)
    h = jnp.dot(xb, w1.astype(jnp.bfloat16), preferred_element_type=jnp.float32) + b1
    h = jnp.maximum(h, 0.0)
    h = jnp.dot(h.astype(jnp.bfloat16), w2.astype(jnp.bfloat16),
                preferred_element_type=jnp.float32) + b2
    h = jnp.maximum(h, 0.0)
    out = jnp.dot(h.astype(jnp.bfloat16), w3.astype(jnp.bfloat16),
                  preferred_element_type=jnp.float32) + b3
    return out


if __name__ == "__main__":
    key = jax.random.PRNGKey(0)
    kx, kp = jax.random.split(key)

    B = 8                      # small batch (padded to one TB=256 tile internally)
    x = jax.random.normal(kx, (B, IN_DIM), jnp.float32)
    params = init_params(kp)

    out = dqn_forward(x, params)
    out = jax.block_until_ready(out)

    ref = reference_forward(x, params)
    assert out.shape == (B, OUT_DIM)
    assert jnp.allclose(out, ref, atol=2e-3, rtol=2e-3), "mismatch vs pure-JAX reference"

    print("KERNEL_OK")
</pallas_src>

<mosaic_0001>
module attributes {stable_mosaic.version = 11 : i64} {
  func.func @dqn_kernel(%arg0: i32, %arg1: memref<256x128xbf16, #tpu.memory_space<vmem>>, %arg2: memref<128x128xbf16, #tpu.memory_space<vmem>>, %arg3: memref<1x128xf32, #tpu.memory_space<vmem>>, %arg4: memref<128x128xbf16, #tpu.memory_space<vmem>>, %arg5: memref<1x128xf32, #tpu.memory_space<vmem>>, %arg6: memref<128x128xbf16, #tpu.memory_space<vmem>>, %arg7: memref<1x128xf32, #tpu.memory_space<vmem>>, %arg8: memref<256x128xf32, #tpu.memory_space<vmem>>) attributes {dimension_semantics = [#tpu.dimension_semantics<parallel>], iteration_bounds = array<i64: 1>, scalar_prefetch = 0 : i64, scratch_operands = 0 : i64, tpu.core_type = #tpu.core_type<tc>, window_params = [{transform_indices = @transform_0, window_bounds = array<i64: 256, 128>}, {pipeline_mode = #tpu.pipeline_mode<synchronous>, transform_indices = @transform_1, window_bounds = array<i64: 128, 128>}, {pipeline_mode = #tpu.pipeline_mode<synchronous>, transform_indices = @transform_2, window_bounds = array<i64: 1, 128>}, {pipeline_mode = #tpu.pipeline_mode<synchronous>, transform_indices = @transform_3, window_bounds = array<i64: 128, 128>}, {pipeline_mode = #tpu.pipeline_mode<synchronous>, transform_indices = @transform_4, window_bounds = array<i64: 1, 128>}, {pipeline_mode = #tpu.pipeline_mode<synchronous>, transform_indices = @transform_5, window_bounds = array<i64: 128, 128>}, {pipeline_mode = #tpu.pipeline_mode<synchronous>, transform_indices = @transform_6, window_bounds = array<i64: 1, 128>}, {transform_indices = @transform_7, window_bounds = array<i64: 256, 128>}]} {
    %c0 = arith.constant 0 : index
    %c0_0 = arith.constant 0 : index
    %0 = vector.load %arg1[%c0, %c0_0] : memref<256x128xbf16, #tpu.memory_space<vmem>>, vector<256x128xbf16>
    %c0_1 = arith.constant 0 : index
    %c0_2 = arith.constant 0 : index
    %1 = vector.load %arg2[%c0_1, %c0_2] : memref<128x128xbf16, #tpu.memory_space<vmem>>, vector<128x128xbf16>
    %cst = arith.constant dense<0.000000e+00> : vector<256x128xf32>
    %2 = tpu.matmul %0, %1, %cst {dimension_numbers = #tpu.dot_dimension_numbers<[1], [0], [0], [1], [0, 0, 1, 1], [], []>} : vector<256x128xbf16>, vector<128x128xbf16>, vector<256x128xf32> -> vector<256x128xf32>
    %c0_3 = arith.constant 0 : index
    %c0_4 = arith.constant 0 : index
    %3 = vector.load %arg3[%c0_3, %c0_4] : memref<1x128xf32, #tpu.memory_space<vmem>>, vector<1x128xf32>
    %4 = vector.broadcast %3 : vector<1x128xf32> to vector<256x128xf32>
    %5 = arith.addf %2, %4 : vector<256x128xf32>
    %cst_5 = arith.constant 0.000000e+00 : f32
    %6 = vector.broadcast %cst_5 : f32 to vector<256x128xf32>
    %7 = arith.maximumf %5, %6 : vector<256x128xf32>
    %8 = arith.truncf %7 : vector<256x128xf32> to vector<256x128xbf16>
    %c0_6 = arith.constant 0 : index
    %c0_7 = arith.constant 0 : index
    %9 = vector.load %arg4[%c0_6, %c0_7] : memref<128x128xbf16, #tpu.memory_space<vmem>>, vector<128x128xbf16>
    %cst_8 = arith.constant dense<0.000000e+00> : vector<256x128xf32>
    %10 = tpu.matmul %8, %9, %cst_8 {dimension_numbers = #tpu.dot_dimension_numbers<[1], [0], [0], [1], [0, 0, 1, 1], [], []>} : vector<256x128xbf16>, vector<128x128xbf16>, vector<256x128xf32> -> vector<256x128xf32>
    %c0_9 = arith.constant 0 : index
    %c0_10 = arith.constant 0 : index
    %11 = vector.load %arg5[%c0_9, %c0_10] : memref<1x128xf32, #tpu.memory_space<vmem>>, vector<1x128xf32>
    %12 = vector.broadcast %11 : vector<1x128xf32> to vector<256x128xf32>
    %13 = arith.addf %10, %12 : vector<256x128xf32>
    %cst_11 = arith.constant 0.000000e+00 : f32
    %14 = vector.broadcast %cst_11 : f32 to vector<256x128xf32>
    %15 = arith.maximumf %13, %14 : vector<256x128xf32>
    %16 = arith.truncf %15 : vector<256x128xf32> to vector<256x128xbf16>
    %c0_12 = arith.constant 0 : index
    %c0_13 = arith.constant 0 : index
    %17 = vector.load %arg6[%c0_12, %c0_13] : memref<128x128xbf16, #tpu.memory_space<vmem>>, vector<128x128xbf16>
    %cst_14 = arith.constant dense<0.000000e+00> : vector<256x128xf32>
    %18 = tpu.matmul %16, %17, %cst_14 {dimension_numbers = #tpu.dot_dimension_numbers<[1], [0], [0], [1], [0, 0, 1, 1], [], []>} : vector<256x128xbf16>, vector<128x128xbf16>, vector<256x128xf32> -> vector<256x128xf32>
    %c0_15 = arith.constant 0 : index
    %c0_16 = arith.constant 0 : index
    %19 = vector.load %arg7[%c0_15, %c0_16] : memref<1x128xf32, #tpu.memory_space<vmem>>, vector<1x128xf32>
    %20 = vector.broadcast %19 : vector<1x128xf32> to vector<256x128xf32>
    %21 = arith.addf %18, %20 : vector<256x128xf32>
    %c0_17 = arith.constant 0 : index
    %c0_18 = arith.constant 0 : index
    %22 = vector.load %arg8[%c0_17, %c0_18] : memref<256x128xf32, #tpu.memory_space<vmem>>, vector<256x128xf32>
    tpu.vector_store %arg8[%c0_17, %c0_18], %21 {strides = array<i32>} : memref<256x128xf32, #tpu.memory_space<vmem>>, vector<256x128xf32>,
    return
  }
  func.func @transform_0(%arg0: i32) -> (i32, i32) {
    %c0_i32 = arith.constant 0 : i32
    %c0_i32_0 = arith.constant 0 : i32
    return %arg0, %c0_i32 : i32, i32
  }
  func.func @transform_1(%arg0: i32) -> (i32, i32) {
    %c0_i32 = arith.constant 0 : i32
    %c0_i32_0 = arith.constant 0 : i32
    %c0_i32_1 = arith.constant 0 : i32
    return %c0_i32, %c0_i32_0 : i32, i32
  }
  func.func @transform_2(%arg0: i32) -> (i32, i32) {
    %c0_i32 = arith.constant 0 : i32
    %c0_i32_0 = arith.constant 0 : i32
    %c0_i32_1 = arith.constant 0 : i32
    return %c0_i32, %c0_i32_0 : i32, i32
  }
  func.func @transform_3(%arg0: i32) -> (i32, i32) {
    %c0_i32 = arith.constant 0 : i32
    %c0_i32_0 = arith.constant 0 : i32
    %c0_i32_1 = arith.constant 0 : i32
    return %c0_i32, %c0_i32_0 : i32, i32
  }
  func.func @transform_4(%arg0: i32) -> (i32, i32) {
    %c0_i32 = arith.constant 0 : i32
    %c0_i32_0 = arith.constant 0 : i32
    %c0_i32_1 = arith.constant 0 : i32
    return %c0_i32, %c0_i32_0 : i32, i32
  }
  func.func @transform_5(%arg0: i32) -> (i32, i32) {
    %c0_i32 = arith.constant 0 : i32
    %c0_i32_0 = arith.constant 0 : i32
    %c0_i32_1 = arith.constant 0 : i32
    return %c0_i32, %c0_i32_0 : i32, i32
  }
  func.func @transform_6(%arg0: i32) -> (i32, i32) {
    %c0_i32 = arith.constant 0 : i32
    %c0_i32_0 = arith.constant 0 : i32
    %c0_i32_1 = arith.constant 0 : i32
    return %c0_i32, %c0_i32_0 : i32, i32
  }
  func.func @transform_7(%arg0: i32) -> (i32, i32) {
    %c0_i32 = arith.constant 0 : i32
    %c0_i32_0 = arith.constant 0 : i32
    return %arg0, %c0_i32 : i32, i32
  }
}

</mosaic_0001>

<bundles_post_ra>
// kernel: tpu_custom_call.1
= control target key start
LH: loop header
LB: loop body
LE: loop exit
PB: predicated region body
PF: predicated region fallthrough
CT: control target
= control target key end

     0   :  { %12 = vsyncpa [#allocation3], 0  ;;  %s1754_s0 = inlined_call_operand.hbm [shape: bf16[256,128], index: 0, kind: input, shape index: {}]   ;;  %s1755_s1 = inlined_call_operand.hbm [shape: bf16[128,128], index: 1, kind: input, shape index: {}]   ;;  %s1756_s2 = inlined_call_operand.vmem [shape: f32[1,128], index: 2, kind: input, shape index: {}]   ;;  %s1757_s3 = inlined_call_operand.hbm [shape: bf16[128,128], index: 3, kind: input, shape index: {}]   ;;  %s1758_s4 = inlined_call_operand.vmem [shape: f32[1,128], index: 4, kind: input, shape index: {}]   ;;  %s1759_s5 = inlined_call_operand.hbm [shape: bf16[128,128], index: 5, kind: input, shape index: {}]   ;;  %s1760_s6 = inlined_call_operand.vmem [shape: f32[1,128], index: 6, kind: input, shape index: {}]   ;;  %s1761_s7 = inlined_call_operand.hbm [shape: f32[256,128], index: 7, kind: output, shape index: {}]  }
   0x1   :  { %13 = vsyncpa [#allocation6], 0 }
   0x2   :  { %14 = vsyncpa [#allocation9], 0 }
   0x3   :  { %15 = vsyncpa [#allocation4], 0  ;;  %s1496_s24 = smov [#allocation5]   ;;  %s1497_s26 = smov [#allocation2]  }
   0x4   :  { %s33_s25 = sshll.u32 %s1496_s24, 4  ;;  %s21_s27 = sshll.u32 %s1497_s26, 4  ;;  %s34_s25 = int_to_ptr.vmem [resolvable:$true] %s33_s25  ;;  %s1545_s27 = int_to_ptr.vmem [resolvable:$true] %s21_s27 }
   0x5   :  { %s1378_s30 = scalar_lea.hbm %s1755_s1, 1024 }
   0x6   :  { %p1379_p0 = scmp.ne.s32.totalorder %s1755_s1, %s1378_s30  ;;  %p1382_p1 = scmp.lt.u32.totalorder %s1378_s30, %s1755_s1 }
   0x8   :  { %p1384_p2 = pnand %p1382_p1, %p1379_p0 }
   0xa   :  { %1387 = shalt.err (!%p1384_p2)
}
   0xb   :  { %s1388_s12 = scalar_lea.vmem %s34_s25, 1024  ;;  %p1393_p4 = scmp.lt.s32.totalorder %s34_s25, %s34_s25 }
   0xc   :  { %p1389_p3 = scmp.ne.s32.totalorder %s34_s25, %s1388_s12  ;;  %p1394_p5 = scmp.lt.s32.totalorder %s1388_s12, %s1388_s12 }
   0xe   :  { %p1395_p6 = por %p1394_p5, %p1393_p4 }
  0x10   :  { %p1396_p7 = pnand %p1395_p6, %p1389_p3 }
  0x12   :  { %1399 = shalt.err (!%p1396_p7)
}
  0x13   :  { %s1498_s13 = smov 64   ;;  %s1499_s14 = smov 4  }
  0x14   :  { %39 = dma.hbm_to_vmem [thread:$0]  %s1755_s1, 1024, %s34_s25, [#allocation6], %s1498_s13, %s1498_s13, %s1499_s14  }
  0x15   :  { %s1400_s19 = scalar_lea.hbm %s1754_s0, 2048 }
  0x16   :  { %p1401_p8 = scmp.ne.s32.totalorder %s1754_s0, %s1400_s19  ;;  %p1404_p9 = scmp.lt.u32.totalorder %s1400_s19, %s1754_s0 }
  0x18   :  { %p1406_p10 = pnand %p1404_p9, %p1401_p8 }
  0x1a   :  { %1409 = shalt.err (!%p1406_p10)
}
  0x1b   :  { %s1410_s24 = scalar_lea.vmem %s1545_s27, 2048  ;;  %p1415_p12 = scmp.lt.s32.totalorder %s1545_s27, %s1545_s27 }
  0x1c   :  { %p1411_p11 = scmp.ne.s32.totalorder %s1545_s27, %s1410_s24  ;;  %p1416_p13 = scmp.lt.s32.totalorder %s1410_s24, %s1410_s24 }
  0x1e   :  { %p1417_p0 = por %p1416_p13, %p1415_p12 }
  0x20   :  { %p1418_p1 = pnand %p1417_p0, %p1411_p11 }
  0x22   :  { %1421 = shalt.err (!%p1418_p1)
}
  0x23   :  { %27 = dma.hbm_to_vmem [thread:$0]  %s1754_s0, 2048, %s1545_s27, [#allocation3], %s1498_s13, %s1498_s13, %s1499_s14  }
  0x24   :  { %s1500_s26 = smov [#allocation7]   ;;  %s1501_s29 = smov [#allocation8]  }
  0x25   :  { %s47_s28 = sshll.u32 %s1500_s26, 4  ;;  %s61_s30 = sshll.u32 %s1501_s29, 4  ;;  %s48_s28 = int_to_ptr.vmem [resolvable:$true] %s47_s28  ;;  %s1582_s30 = int_to_ptr.vmem [resolvable:$true] %s61_s30 }
  0x26   :  { %s1422_s10 = scalar_lea.hbm %s1757_s3, 1024 }
  0x27   :  { %p1423_p2 = scmp.ne.s32.totalorder %s1757_s3, %s1422_s10  ;;  %p1426_p3 = scmp.lt.u32.totalorder %s1422_s10, %s1757_s3 }
  0x29   :  { %p1428_p4 = pnand %p1426_p3, %p1423_p2 }
  0x2b   :  { %1431 = shalt.err (!%p1428_p4)
}
  0x2c   :  { %s1432_s0 = scalar_lea.vmem %s48_s28, 1024  ;;  %p1437_p6 = scmp.lt.s32.totalorder %s48_s28, %s48_s28 }
  0x2d   :  { %p1433_p5 = scmp.ne.s32.totalorder %s48_s28, %s1432_s0  ;;  %p1438_p7 = scmp.lt.s32.totalorder %s1432_s0, %s1432_s0 }
  0x2f   :  { %p1439_p8 = por %p1438_p7, %p1437_p6 }
  0x31   :  { %p1440_p9 = pnand %p1439_p8, %p1433_p5 }
  0x33   :  { %1443 = shalt.err (!%p1440_p9)
}
  0x34   :  { %53 = dma.hbm_to_vmem [thread:$0]  %s1757_s3, 1024, %s48_s28, [#allocation6], %s1498_s13, %s1498_s13, %s1499_s14  }
  0x35   :  { %s1444_s20 = scalar_lea.hbm %s1759_s5, 1024 }
  0x36   :  { %p1445_p10 = scmp.ne.s32.totalorder %s1759_s5, %s1444_s20  ;;  %p1448_p11 = scmp.lt.u32.totalorder %s1444_s20, %s1759_s5 }
  0x38   :  { %p1450_p12 = pnand %p1448_p11, %p1445_p10 }
  0x3a   :  { %1453 = shalt.err (!%p1450_p12)
}
  0x3b   :  { %s1454_s1 = scalar_lea.vmem %s1582_s30, 1024  ;;  %p1459_p0 = scmp.lt.s32.totalorder %s1582_s30, %s1582_s30 }
  0x3c   :  { %p1455_p13 = scmp.ne.s32.totalorder %s1582_s30, %s1454_s1  ;;  %p1460_p1 = scmp.lt.s32.totalorder %s1454_s1, %s1454_s1 }
  0x3e   :  { %p1461_p2 = por %p1460_p1, %p1459_p0 }
  0x40   :  { %p1462_p3 = pnand %p1461_p2, %p1455_p13 }
  0x42   :  { %1465 = shalt.err (!%p1462_p3)
}
  0x43   :  { %67 = dma.hbm_to_vmem [thread:$0]  %s1759_s5, 1024, %s1582_s30, [#allocation9], %s1498_s13, %s1498_s13, %s1499_s14  }
  0x44   :  { %1488 = dma.done.wait [#allocation3], 2048  }
  0x45   :  { %1489 = vsyncadd [#allocation3], 4294965248 }
  0x46   :  { %1490 = dma.done.wait [#allocation6], 2048  }
  0x47   :  { %1491 = vsyncadd [#allocation6], 4294965248 }
  0x48   :  { %1492 = dma.done.wait [#allocation9], 1024  }
  0x49   :  { %1493 = vsyncadd [#allocation9], 4294966272  ;;  %v1338_v0 = vld [vmem:[#allocation5] sm:$0xff]   ;;  %v1339_v1 = vld [vmem:[#allocation5 + $0x8] sm:$0xff]  }
  0x4a   :  { %1169 = vmatprep.subr.bf16.mxu0 %v1338_v0  ;;  %1313 = vmatprep.subr.bf16.mxu1 %v1338_v0  ;;  %v1340_v2 = vld [vmem:[#allocation5 + $0x10] sm:$0xff]   ;;  %v1341_v3 = vld [vmem:[#allocation5 + $0x18] sm:$0xff]   ;;  %v1346_v4 = vld [vmem:[#allocation2] sm:$0xff]  }
  0x4b   :  { %1170 = vmatpush3.bf16.msra.mxu0 %v1338_v0  ;;  %1321 = vmatpush3.bf16.msra.mxu1 %v1338_v0  ;;  %v1342_v5 = vld [vmem:[#allocation5 + $0x20] sm:$0xff]   ;;  %v1343_v6 = vld [vmem:[#allocation5 + $0x28] sm:$0xff]   ;;  %v1344_v8 = vld [vmem:[#allocation5 + $0x30] sm:$0xff]  }
  0x4c   :  { %1171 = vmatprep.subr.bf16.mxu0 %v1339_v1  ;;  %1314 = vmatprep.subr.bf16.mxu1 %v1339_v1  ;;  %v1354_v7 = vld [vmem:[#allocation2 + $0x40] sm:$0xff]   ;;  %v1345_v9 = vld [vmem:[#allocation5 + $0x38] sm:$0xff]   ;;  %v1347_v10 = vld [vmem:[#allocation2 + $0x8] sm:$0xff]  }
  0x4d   :  { %1185 = vmatprep.mubr.bf16.mxu0 %v1346_v4  ;;  %1201 = vmatprep.mubr.bf16.mxu1 %v1354_v7  ;;  %v1355_v11 = vld [vmem:[#allocation2 + $0x48] sm:$0xff]   ;;  %v1362_v12 = vld [vmem:[#allocation7] sm:$0xff]   ;;  %v1348_v13 = vld [vmem:[#allocation2 + $0x10] sm:$0xff]  }
  0x4e   :  { %v1356_v14 = vld [vmem:[#allocation2 + $0x50] sm:$0xff]   ;;  %v1363_v15 = vld [vmem:[#allocation7 + $0x8] sm:$0xff]   ;;  %v1349_v17 = vld [vmem:[#allocation2 + $0x18] sm:$0xff]  }
  0x4f   :  { %1172 = vmatpush3.bf16.msra.mxu0 %v1339_v1  ;;  %1322 = vmatpush3.bf16.msra.mxu1 %v1339_v1  ;;  %v1364_v16 = vld [vmem:[#allocation7 + $0x10] sm:$0xff]   ;;  %v1357_v18 = vld [vmem:[#allocation2 + $0x58] sm:$0xff]   ;;  %v1350_v19 = vld [vmem:[#allocation2 + $0x20] sm:$0xff]  }
  0x50   :  { %1173 = vmatprep.subr.bf16.mxu0 %v1340_v2  ;;  %1315 = vmatprep.subr.bf16.mxu1 %v1340_v2  ;;  %v1358_v20 = vld [vmem:[#allocation2 + $0x60] sm:$0xff]   ;;  %v1365_v21 = vld [vmem:[#allocation7 + $0x18] sm:$0xff]   ;;  %v1351_v23 = vld [vmem:[#allocation2 + $0x28] sm:$0xff]  }
  0x51   :  { %v1366_v22 = vld [vmem:[#allocation7 + $0x20] sm:$0xff]   ;;  %v1359_v24 = vld [vmem:[#allocation2 + $0x68] sm:$0xff]   ;;  %v1352_v25 = vld [vmem:[#allocation2 + $0x30] sm:$0xff]  }
  0x52   :  { %v1360_v26 = vld [vmem:[#allocation2 + $0x70] sm:$0xff]   ;;  %v1367_v27 = vld [vmem:[#allocation7 + $0x28] sm:$0xff]   ;;  %v1353_v28 = vld [vmem:[#allocation2 + $0x38] sm:$0xff]  }
  0x53   :  { %1174 = vmatpush3.bf16.msra.mxu0 %v1340_v2  ;;  %1323 = vmatpush3.bf16.msra.mxu1 %v1340_v2  ;;  %v1361_v29 = vld [vmem:[#allocation2 + $0x78] sm:$0xff]   ;;  %v1368_v30 = vld [vmem:[#allocation7 + $0x30] sm:$0xff]   ;;  %v1370_v32 = vld [vmem:[#allocation8] sm:$0xff]  }
  0x54   :  { %1175 = vmatprep.subr.bf16.mxu0 %v1341_v3  ;;  %1316 = vmatprep.subr.bf16.mxu1 %v1341_v3  ;;  %v1369_v31 = vld [vmem:[#allocation7 + $0x38] sm:$0xff]   ;;  %v1371_v33 = vld [vmem:[#allocation8 + $0x8] sm:$0xff]   ;;  %v1372_v34 = vld [vmem:[#allocation8 + $0x10] sm:$0xff]  }
  0x55   :  { %v1373_v35 = vld [vmem:[#allocation8 + $0x18] sm:$0xff]   ;;  %v1374_v36 = vld [vmem:[#allocation8 + $0x20] sm:$0xff]   ;;  %v1375_v37 = vld [vmem:[#allocation8 + $0x28] sm:$0xff]  }
  0x56   :  { %v1622_v38 = vld [vmem:[%s1756_s2] ss:$0 sm:$0xff] }
  0x57   :  { %1176 = vmatpush3.bf16.msra.mxu0 %v1341_v3  ;;  %1324 = vmatpush3.bf16.msra.mxu1 %v1341_v3 }
  0x58   :  { %1177 = vmatprep.subr.bf16.mxu0 %v1342_v5  ;;  %1317 = vmatprep.subr.bf16.mxu1 %v1342_v5 }
  0x5b   :  { %1178 = vmatpush3.bf16.msra.mxu0 %v1342_v5  ;;  %1325 = vmatpush3.bf16.msra.mxu1 %v1342_v5 }
  0x5c   :  { %1179 = vmatprep.subr.bf16.mxu0 %v1343_v6  ;;  %1318 = vmatprep.subr.bf16.mxu1 %v1343_v6 }
  0x5f   :  { %1180 = vmatpush3.bf16.msra.mxu0 %v1343_v6  ;;  %1326 = vmatpush3.bf16.msra.mxu1 %v1343_v6 }
  0x60   :  { %1181 = vmatprep.subr.bf16.mxu0 %v1344_v8  ;;  %1319 = vmatprep.subr.bf16.mxu1 %v1344_v8 }
  0x63   :  { %1182 = vmatpush3.bf16.msra.mxu0 %v1344_v8  ;;  %1327 = vmatpush3.bf16.msra.mxu1 %v1344_v8 }
  0x64   :  { %1183 = vmatprep.subr.bf16.mxu0 %v1345_v9  ;;  %1320 = vmatprep.subr.bf16.mxu1 %v1345_v9 }
  0x67   :  { %1184 = vmatpush3.bf16.msra.mxu0 %v1345_v9  ;;  %1328 = vmatpush3.bf16.msra.mxu1 %v1345_v9 }
  0x68   :  { %1217 = vmatprep.subr.bf16.mxu1 %v1362_v12  ;;  %1265 = vmatprep.subr.bf16.mxu0 %v1370_v32 }
  0x6a   :  { %1186 = vmatmul.mubr.bf16.vlgmr.msra.gmra.mrb[0].mxu0 %v1347_v10  ;;  %1202 = vmatmul.mubr.bf16.vlgmr.msra.gmra.mrb[0].mxu1 %v1355_v11 }
  0x6b   :  { %1189 = vmatprep.mubr.bf16.mxu0 %v1348_v13  ;;  %1205 = vmatprep.mubr.bf16.mxu1 %v1356_v14 }
  0x6c   :  { %1218 = vmatpush3.bf16.msra.mxu1 %v1362_v12  ;;  %1266 = vmatpush3.bf16.msra.mxu0 %v1370_v32 }
  0x6d   :  { %1219 = vmatprep.subr.bf16.mxu1 %v1363_v15  ;;  %1267 = vmatprep.subr.bf16.mxu0 %v1371_v33 }
  0x70   :  { %1220 = vmatpush3.bf16.msra.mxu1 %v1363_v15  ;;  %1268 = vmatpush3.bf16.msra.mxu0 %v1371_v33 }
  0x71   :  { %1221 = vmatprep.subr.bf16.mxu1 %v1364_v16  ;;  %1269 = vmatprep.subr.bf16.mxu0 %v1372_v34 }
  0x72   :  { %1190 = vmatmul.mubr.bf16.gmra.mrb[4].mxu0 %v1349_v17  ;;  %1206 = vmatmul.mubr.bf16.gmra.mrb[4].mxu1 %v1357_v18 }
  0x73   :  { %1193 = vmatprep.mubr.bf16.mxu0 %v1350_v19  ;;  %1209 = vmatprep.mubr.bf16.mxu1 %v1358_v20 }
  0x74   :  { %1222 = vmatpush3.bf16.msra.mxu1 %v1364_v16  ;;  %1270 = vmatpush3.bf16.msra.mxu0 %v1372_v34 }
  0x75   :  { %1223 = vmatprep.subr.bf16.mxu1 %v1365_v21  ;;  %1271 = vmatprep.subr.bf16.mxu0 %v1373_v35 }
  0x78   :  { %1224 = vmatpush3.bf16.msra.mxu1 %v1365_v21  ;;  %1272 = vmatpush3.bf16.msra.mxu0 %v1373_v35 }
  0x79   :  { %1225 = vmatprep.subr.bf16.mxu1 %v1366_v22  ;;  %1273 = vmatprep.subr.bf16.mxu0 %v1374_v36 }
  0x7a   :  { %1194 = vmatmul.mubr.bf16.gmra.mrb[8].mxu0 %v1351_v23  ;;  %1210 = vmatmul.mubr.bf16.gmra.mrb[8].mxu1 %v1359_v24 }
  0x7b   :  { %1197 = vmatprep.mubr.bf16.mxu0 %v1352_v25  ;;  %1213 = vmatprep.mubr.bf16.mxu1 %v1360_v26 }
  0x7c   :  { %1226 = vmatpush3.bf16.msra.mxu1 %v1366_v22  ;;  %1274 = vmatpush3.bf16.msra.mxu0 %v1374_v36 }
  0x7d   :  { %1227 = vmatprep.subr.bf16.mxu1 %v1367_v27  ;;  %1275 = vmatprep.subr.bf16.mxu0 %v1375_v37 }
  0x80   :  { %1228 = vmatpush3.bf16.msra.mxu1 %v1367_v27  ;;  %1276 = vmatpush3.bf16.msra.mxu0 %v1375_v37 }
  0x81   :  { %1229 = vmatprep.subr.bf16.mxu1 %v1368_v30 }
  0x82   :  { %1198 = vmatmul.mubr.bf16.gmra.mrb[12].mxu0 %v1353_v28  ;;  %1214 = vmatmul.mubr.bf16.gmra.mrb[12].mxu1 %v1361_v29 }
  0x84   :  { %1230 = vmatpush3.bf16.msra.mxu1 %v1368_v30 }
  0x85   :  { %1231 = vmatprep.subr.bf16.mxu1 %v1369_v31 }
  0x88   :  { %1232 = vmatpush3.bf16.msra.mxu1 %v1369_v31 }
 0x13d   :  { %v1187_v39 = vpop.f32.mrb[0].mxu0  ;;  %v1203_v40 = vpop.f32.mrb[0].mxu1 }
 0x13e   :  { %v325_v41 = vadd.f32 %v1187_v39, %v1622_v38  ;;  %v316_v42 = vpop.f32.mrb[1].mxu0  ;;  %v389_v43 = vadd.f32 %v1203_v40, %v1622_v38  ;;  %v380_v44 = vpop.f32.mrb[1].mxu1 }
 0x13f   :  { %v317_v45 = vadd.f32 %v1622_v38, %v316_v42  ;;  %v1188_v46 = vpop.f32.mrb[2].mxu0  ;;  %v381_v47 = vadd.f32 %v1622_v38, %v380_v44  ;;  %v1204_v48 = vpop.f32.mrb[2].mxu1 }
 0x140   :  { %v328_v49 = vadd.f32 %v1188_v46, %v1622_v38  ;;  %v319_v50 = vpop.f32.mrb[3].mxu0  ;;  %v461_v51 = vmax.f32 %v389_v43, 0.0  ;;  %v392_v52 = vadd.f32 %v1204_v48, %v1622_v38  ;;  %v383_v53 = vpop.f32.mrb[3].mxu1  ;;  %v445_v57 = vmax.f32 %v325_v41, 0.0 }
 0x141   :  { %v320_v54 = vadd.f32 %v1622_v38, %v319_v50  ;;  %v459_v55 = vmax.f32 %v381_v47, 0.0  ;;  %v384_v56 = vadd.f32 %v1622_v38, %v383_v53  ;;  %v443_v60 = vmax.f32 %v317_v45, 0.0 }
 0x142   :  { %v446_v58 = vmax.f32 %v328_v49, 0.0  ;;  %v462_v59 = vmax.f32 %v392_v52, 0.0 }
 0x143   :  { %v444_v61 = vmax.f32 %v320_v54, 0.0  ;;  %v460_v62 = vmax.f32 %v384_v56, 0.0 }
 0x144   :  { %v476_v63 = vpack.c.bf16 %v446_v58, %v445_v57  ;;  %v1632_v0 = vpack.c.bf16 %v462_v59, %v461_v51 }
 0x145   :  { %v475_v1 = vpack.c.bf16 %v444_v61, %v443_v60  ;;  %v1191_v2 = vpop.f32.mrb[4].mxu0  ;;  %v1634_v3 = vpack.c.bf16 %v460_v62, %v459_v55  ;;  %v1207_v4 = vpop.f32.mrb[4].mxu1 }
 0x146   :  { %v341_v5 = vadd.f32 %v1191_v2, %v1622_v38  ;;  %v332_v6 = vpop.f32.mrb[5].mxu0  ;;  %v405_v7 = vadd.f32 %v1207_v4, %v1622_v38  ;;  %v396_v8 = vpop.f32.mrb[5].mxu1 }
 0x147   :  { %v333_v9 = vadd.f32 %v1622_v38, %v332_v6  ;;  %v1192_v10 = vpop.f32.mrb[6].mxu0  ;;  %1233 = vmatprep.mubr.bf16.mxu1 %v475_v1  ;;  %v397_v11 = vadd.f32 %v1622_v38, %v396_v8  ;;  %v1208_v12 = vpop.f32.mrb[6].mxu1 }
 0x148   :  { %v344_v13 = vadd.f32 %v1192_v10, %v1622_v38  ;;  %v335_v14 = vpop.f32.mrb[7].mxu0  ;;  %1234 = vmatmul.mubr.bf16.vlgmr.msra.gmra.mrb[16].mxu1 %v476_v63  ;;  %v465_v15 = vmax.f32 %v405_v7, 0.0  ;;  %v408_v16 = vadd.f32 %v1208_v12, %v1622_v38  ;;  %v399_v17 = vpop.f32.mrb[7].mxu1  ;;  %v449_v21 = vmax.f32 %v341_v5, 0.0 }
 0x149   :  { %v336_v18 = vadd.f32 %v1622_v38, %v335_v14  ;;  %v463_v19 = vmax.f32 %v397_v11, 0.0  ;;  %v400_v20 = vadd.f32 %v1622_v38, %v399_v17  ;;  %v447_v24 = vmax.f32 %v333_v9, 0.0 }
 0x14a   :  { %v450_v22 = vmax.f32 %v344_v13, 0.0  ;;  %v466_v23 = vmax.f32 %v408_v16, 0.0 }
 0x14b   :  { %v448_v25 = vmax.f32 %v336_v18, 0.0  ;;  %v464_v26 = vmax.f32 %v400_v20, 0.0 }
 0x14c   :  { %v478_v27 = vpack.c.bf16 %v450_v22, %v449_v21  ;;  %v1644_v28 = vpack.c.bf16 %v466_v23, %v465_v15 }
 0x14d   :  { %v477_v29 = vpack.c.bf16 %v448_v25, %v447_v24  ;;  %v1195_v30 = vpop.f32.mrb[8].mxu0  ;;  %v1646_v31 = vpack.c.bf16 %v464_v26, %v463_v19  ;;  %v1211_v32 = vpop.f32.mrb[8].mxu1  ;;  %v1377_v26 = vld [vmem:[#allocation8 + $0x38] sm:$0xff]  }
 0x14e   :  { %v357_v33 = vadd.f32 %v1195_v30, %v1622_v38  ;;  %v348_v34 = vpop.f32.mrb[9].mxu0  ;;  %v421_v35 = vadd.f32 %v1211_v32, %v1622_v38  ;;  %v412_v36 = vpop.f32.mrb[9].mxu1 }
 0x14f   :  { %v349_v37 = vadd.f32 %v1622_v38, %v348_v34  ;;  %v1196_v39 = vpop.f32.mrb[10].mxu0  ;;  %1237 = vmatprep.mubr.bf16.mxu1 %v477_v29  ;;  %v413_v40 = vadd.f32 %v1622_v38, %v412_v36  ;;  %v1212_v41 = vpop.f32.mrb[10].mxu1 }
 0x150   :  { %v360_v42 = vadd.f32 %v1196_v39, %v1622_v38  ;;  %v351_v43 = vpop.f32.mrb[11].mxu0  ;;  %1238 = vmatmul.mubr.bf16.gmra.mrb[20].mxu1 %v478_v27  ;;  %v469_v44 = vmax.f32 %v421_v35, 0.0  ;;  %v424_v45 = vadd.f32 %v1212_v41, %v1622_v38  ;;  %v415_v46 = vpop.f32.mrb[11].mxu1  ;;  %v453_v50 = vmax.f32 %v357_v33, 0.0 }
 0x151   :  { %v352_v47 = vadd.f32 %v1622_v38, %v351_v43  ;;  %v467_v48 = vmax.f32 %v413_v40, 0.0  ;;  %v416_v49 = vadd.f32 %v1622_v38, %v415_v46  ;;  %v451_v53 = vmax.f32 %v349_v37, 0.0 }
 0x152   :  { %v454_v51 = vmax.f32 %v360_v42, 0.0  ;;  %v470_v52 = vmax.f32 %v424_v45, 0.0 }
 0x153   :  { %v452_v54 = vmax.f32 %v352_v47, 0.0  ;;  %v468_v55 = vmax.f32 %v416_v49, 0.0 }
 0x154   :  { %v480_v56 = vpack.c.bf16 %v454_v51, %v453_v50  ;;  %v488_v57 = vpack.c.bf16 %v470_v52, %v469_v44 }
 0x155   :  { %v479_v58 = vpack.c.bf16 %v452_v54, %v451_v53  ;;  %v1199_v59 = vpop.f32.mrb[12].mxu0  ;;  %v487_v60 = vpack.c.bf16 %v468_v55, %v467_v48  ;;  %v1215_v61 = vpop.f32.mrb[12].mxu1 }
 0x156   :  { %v373_v62 = vadd.f32 %v1199_v59, %v1622_v38  ;;  %v364_v63 = vpop.f32.mrb[13].mxu0  ;;  %v437_v1 = vadd.f32 %v1215_v61, %v1622_v38  ;;  %v428_v2 = vpop.f32.mrb[13].mxu1 }
 0x157   :  { %v365_v4 = vadd.f32 %v1622_v38, %v364_v63  ;;  %v1200_v5 = vpop.f32.mrb[14].mxu0  ;;  %1241 = vmatprep.mubr.bf16.mxu1 %v479_v58  ;;  %v429_v6 = vadd.f32 %v1622_v38, %v428_v2  ;;  %v1216_v7 = vpop.f32.mrb[14].mxu1 }
 0x158   :  { %v376_v8 = vadd.f32 %v1200_v5, %v1622_v38  ;;  %v367_v9 = vpop.f32.mrb[15].mxu0  ;;  %1242 = vmatmul.mubr.bf16.gmra.mrb[24].mxu1 %v480_v56  ;;  %v473_v10 = vmax.f32 %v437_v1, 0.0  ;;  %v440_v11 = vadd.f32 %v1216_v7, %v1622_v38  ;;  %v431_v12 = vpop.f32.mrb[15].mxu1  ;;  %v457_v16 = vmax.f32 %v373_v62, 0.0 }
 0x159   :  { %v368_v13 = vadd.f32 %v1622_v38, %v367_v9  ;;  %v471_v14 = vmax.f32 %v429_v6, 0.0  ;;  %v432_v15 = vadd.f32 %v1622_v38, %v431_v12  ;;  %v455_v19 = vmax.f32 %v365_v4, 0.0  ;;  %v1376_v38 = vld [vmem:[#allocation8 + $0x30] sm:$0xff]  }
 0x15a   :  { %v458_v17 = vmax.f32 %v376_v8, 0.0  ;;  %v474_v18 = vmax.f32 %v440_v11, 0.0  ;;  %1277 = vmatprep.subr.bf16.mxu0 %v1376_v38 }
 0x15b   :  { %v456_v20 = vmax.f32 %v368_v13, 0.0  ;;  %v472_v21 = vmax.f32 %v432_v15, 0.0  ;;  %1278 = vmatpush3.bf16.msra.mxu0 %v1376_v38 }
 0x15c   :  { %v482_v22 = vpack.c.bf16 %v458_v17, %v457_v16  ;;  %v490_v23 = vpack.c.bf16 %v474_v18, %v473_v10  ;;  %1279 = vmatprep.subr.bf16.mxu0 %v1377_v26 }
 0x15d   :  { %v481_v24 = vpack.c.bf16 %v456_v20, %v455_v19  ;;  %v489_v25 = vpack.c.bf16 %v472_v21, %v471_v14 }
 0x15f   :  { %1245 = vmatprep.mubr.bf16.mxu1 %v481_v24  ;;  %1280 = vmatpush3.bf16.msra.mxu0 %v1377_v26 }
 0x160   :  { %1246 = vmatmul.mubr.bf16.gmra.mrb[28].mxu1 %v482_v22 }
 0x161   :  { %1249 = vmatprep.mubr.bf16.mxu1 %v1634_v3  ;;  %v1671_v3 = vld [vmem:[%s1758_s4] ss:$0 sm:$0xff] }
 0x168   :  { %1250 = vmatmul.mubr.bf16.gmra.mrb[32].mxu1 %v1632_v0 }
 0x169   :  { %1253 = vmatprep.mubr.bf16.mxu1 %v1646_v31 }
 0x170   :  { %1254 = vmatmul.mubr.bf16.gmra.mrb[36].mxu1 %v1644_v28 }
 0x171   :  { %1257 = vmatprep.mubr.bf16.mxu1 %v487_v60 }
 0x178   :  { %1258 = vmatmul.mubr.bf16.gmra.mrb[40].mxu1 %v488_v57 }
 0x179   :  { %1261 = vmatprep.mubr.bf16.mxu1 %v489_v25 }
 0x180   :  { %1262 = vmatmul.mubr.bf16.gmra.mrb[44].mxu1 %v490_v23 }
 0x21b   :  { %v1235_v0 = vpop.f32.mrb[16].mxu1 }
 0x21c   :  { %v605_v27 = vadd.f32 %v1235_v0, %v1671_v3  ;;  %v596_v29 = vpop.f32.mrb[17].mxu1 }
 0x21d   :  { %v597_v28 = vadd.f32 %v1671_v3, %v596_v29  ;;  %v1236_v30 = vpop.f32.mrb[18].mxu1 }
 0x21e   :  { %v608_v31 = vadd.f32 %v1236_v30, %v1671_v3  ;;  %v599_v32 = vpop.f32.mrb[19].mxu1  ;;  %v725_v34 = vmax.f32 %v605_v27, 0.0 }
 0x21f   :  { %v600_v33 = vadd.f32 %v1671_v3, %v599_v32  ;;  %v723_v36 = vmax.f32 %v597_v28, 0.0 }
 0x220   :  { %v726_v35 = vmax.f32 %v608_v31, 0.0 }
 0x221   :  { %v724_v37 = vmax.f32 %v600_v33, 0.0 }
 0x222   :  { %v756_v39 = vpack.c.bf16 %v726_v35, %v725_v34 }
 0x223   :  { %v755_v40 = vpack.c.bf16 %v724_v37, %v723_v36  ;;  %v1239_v41 = vpop.f32.mrb[20].mxu1 }
 0x224   :  { %v621_v42 = vadd.f32 %v1239_v41, %v1671_v3  ;;  %v612_v43 = vpop.f32.mrb[21].mxu1 }
 0x225   :  { %v613_v44 = vadd.f32 %v1671_v3, %v612_v43  ;;  %v1240_v45 = vpop.f32.mrb[22].mxu1  ;;  %1281 = vmatprep.mubr.bf16.mxu0 %v755_v40 }
 0x226   :  { %v624_v46 = vadd.f32 %v1240_v45, %v1671_v3  ;;  %v615_v47 = vpop.f32.mrb[23].mxu1  ;;  %1282 = vmatmul.mubr.bf16.vlgmr.msra.gmra.mrb[16].mxu0 %v756_v39  ;;  %v729_v49 = vmax.f32 %v621_v42, 0.0 }
 0x227   :  { %v616_v48 = vadd.f32 %v1671_v3, %v615_v47  ;;  %v727_v51 = vmax.f32 %v613_v44, 0.0 }
 0x228   :  { %v730_v50 = vmax.f32 %v624_v46, 0.0 }
 0x229   :  { %v728_v52 = vmax.f32 %v616_v48, 0.0 }
 0x22a   :  { %v758_v53 = vpack.c.bf16 %v730_v50, %v729_v49 }
 0x22b   :  { %v757_v54 = vpack.c.bf16 %v728_v52, %v727_v51  ;;  %v1243_v55 = vpop.f32.mrb[24].mxu1 }
 0x22c   :  { %v637_v56 = vadd.f32 %v1243_v55, %v1671_v3  ;;  %v628_v57 = vpop.f32.mrb[25].mxu1 }
 0x22d   :  { %v629_v58 = vadd.f32 %v1671_v3, %v628_v57  ;;  %v1244_v59 = vpop.f32.mrb[26].mxu1  ;;  %1285 = vmatprep.mubr.bf16.mxu0 %v757_v54 }
 0x22e   :  { %v640_v60 = vadd.f32 %v1244_v59, %v1671_v3  ;;  %v631_v61 = vpop.f32.mrb[27].mxu1  ;;  %1286 = vmatmul.mubr.bf16.gmra.mrb[20].mxu0 %v758_v53  ;;  %v733_v63 = vmax.f32 %v637_v56, 0.0 }
 0x22f   :  { %v632_v62 = vadd.f32 %v1671_v3, %v631_v61  ;;  %v731_v2 = vmax.f32 %v629_v58, 0.0 }
 0x230   :  { %v734_v1 = vmax.f32 %v640_v60, 0.0 }
 0x231   :  { %v732_v4 = vmax.f32 %v632_v62, 0.0 }
 0x232   :  { %v760_v5 = vpack.c.bf16 %v734_v1, %v733_v63 }
 0x233   :  { %v759_v6 = vpack.c.bf16 %v732_v4, %v731_v2  ;;  %v1247_v7 = vpop.f32.mrb[28].mxu1 }
 0x234   :  { %v653_v8 = vadd.f32 %v1247_v7, %v1671_v3  ;;  %v644_v9 = vpop.f32.mrb[29].mxu1 }
 0x235   :  { %v645_v10 = vadd.f32 %v1671_v3, %v644_v9  ;;  %v1248_v11 = vpop.f32.mrb[30].mxu1  ;;  %1289 = vmatprep.mubr.bf16.mxu0 %v759_v6 }
 0x236   :  { %v656_v12 = vadd.f32 %v1248_v11, %v1671_v3  ;;  %v647_v13 = vpop.f32.mrb[31].mxu1  ;;  %1290 = vmatmul.mubr.bf16.gmra.mrb[24].mxu0 %v760_v5  ;;  %v737_v15 = vmax.f32 %v653_v8, 0.0 }
 0x237   :  { %v648_v14 = vadd.f32 %v1671_v3, %v647_v13  ;;  %v735_v17 = vmax.f32 %v645_v10, 0.0 }
 0x238   :  { %v738_v16 = vmax.f32 %v656_v12, 0.0 }
 0x239   :  { %v736_v18 = vmax.f32 %v648_v14, 0.0  ;;  %v1708_v14 = vld [vmem:[%s1760_s6] ss:$0 sm:$0xff]  ;;  %s1502_s6 = smov [#allocation10]  }
 0x23a   :  { %v762_v19 = vpack.c.bf16 %v738_v16, %v737_v15  ;;  %s1040_s28 = sshll.u32 %s1502_s6, 4  ;;  %s1041_s28 = int_to_ptr.vmem [resolvable:$true] %s1040_s28 }
 0x23b   :  { %v761_v20 = vpack.c.bf16 %v736_v18, %v735_v17  ;;  %v1251_v21 = vpop.f32.mrb[32].mxu1  ;;  %s1466_s29 = scalar_lea.vmem %s1041_s28, 4096  ;;  %p1471_p5 = scmp.lt.s32.totalorder %s1041_s28, %s1041_s28 }
 0x23c   :  { %v669_v22 = vadd.f32 %v1251_v21, %v1671_v3  ;;  %v660_v23 = vpop.f32.mrb[33].mxu1  ;;  %p1467_p4 = scmp.ne.s32.totalorder %s1041_s28, %s1466_s29  ;;  %p1472_p6 = scmp.lt.s32.totalorder %s1466_s29, %s1466_s29 }
 0x23d   :  { %v661_v24 = vadd.f32 %v1671_v3, %v660_v23  ;;  %v1252_v25 = vpop.f32.mrb[34].mxu1  ;;  %1293 = vmatprep.mubr.bf16.mxu0 %v761_v20 }
 0x23e   :  { %v672_v38 = vadd.f32 %v1252_v25, %v1671_v3  ;;  %v663_v26 = vpop.f32.mrb[35].mxu1  ;;  %1294 = vmatmul.mubr.bf16.gmra.mrb[28].mxu0 %v762_v19  ;;  %v741_v27 = vmax.f32 %v669_v22, 0.0  ;;  %p1473_p7 = por %p1472_p6, %p1471_p5 }
 0x23f   :  { %v664_v0 = vadd.f32 %v1671_v3, %v663_v26  ;;  %v739_v28 = vmax.f32 %v661_v24, 0.0 }
 0x240   :  { %v742_v29 = vmax.f32 %v672_v38, 0.0  ;;  %p1474_p8 = pnand %p1473_p7, %p1467_p4 }
 0x241   :  { %v740_v30 = vmax.f32 %v664_v0, 0.0 }
 0x242   :  { %v764_v31 = vpack.c.bf16 %v742_v29, %v741_v27 }
 0x243   :  { %v763_v32 = vpack.c.bf16 %v740_v30, %v739_v28  ;;  %v1255_v33 = vpop.f32.mrb[36].mxu1 }
 0x244   :  { %v685_v34 = vadd.f32 %v1255_v33, %v1671_v3  ;;  %v676_v35 = vpop.f32.mrb[37].mxu1 }
 0x245   :  { %v677_v36 = vadd.f32 %v1671_v3, %v676_v35  ;;  %v1256_v37 = vpop.f32.mrb[38].mxu1  ;;  %1297 = vmatprep.mubr.bf16.mxu0 %v763_v32 }
 0x246   :  { %v688_v39 = vadd.f32 %v1256_v37, %v1671_v3  ;;  %v679_v40 = vpop.f32.mrb[39].mxu1  ;;  %1298 = vmatmul.mubr.bf16.gmra.mrb[32].mxu0 %v764_v31  ;;  %v745_v42 = vmax.f32 %v685_v34, 0.0 }
 0x247   :  { %v680_v41 = vadd.f32 %v1671_v3, %v679_v40  ;;  %v743_v44 = vmax.f32 %v677_v36, 0.0 }
 0x248   :  { %v746_v43 = vmax.f32 %v688_v39, 0.0 }
 0x249   :  { %v744_v45 = vmax.f32 %v680_v41, 0.0 }
 0x24a   :  { %v766_v46 = vpack.c.bf16 %v746_v43, %v745_v42 }
 0x24b   :  { %v765_v47 = vpack.c.bf16 %v744_v45, %v743_v44  ;;  %v1259_v48 = vpop.f32.mrb[40].mxu1 }
 0x24c   :  { %v701_v49 = vadd.f32 %v1259_v48, %v1671_v3  ;;  %v692_v50 = vpop.f32.mrb[41].mxu1 }
 0x24d   :  { %v693_v51 = vadd.f32 %v1671_v3, %v692_v50  ;;  %v1260_v52 = vpop.f32.mrb[42].mxu1  ;;  %1301 = vmatprep.mubr.bf16.mxu0 %v765_v47 }
 0x24e   :  { %v704_v53 = vadd.f32 %v1260_v52, %v1671_v3  ;;  %v695_v54 = vpop.f32.mrb[43].mxu1  ;;  %1302 = vmatmul.mubr.bf16.gmra.mrb[36].mxu0 %v766_v46  ;;  %v749_v56 = vmax.f32 %v701_v49, 0.0 }
 0x24f   :  { %v696_v55 = vadd.f32 %v1671_v3, %v695_v54  ;;  %v747_v58 = vmax.f32 %v693_v51, 0.0 }
 0x250   :  { %v750_v57 = vmax.f32 %v704_v53, 0.0 }
 0x251   :  { %v748_v59 = vmax.f32 %v696_v55, 0.0 }
 0x252   :  { %v768_v60 = vpack.c.bf16 %v750_v57, %v749_v56 }
 0x253   :  { %v767_v61 = vpack.c.bf16 %v748_v59, %v747_v58  ;;  %v1263_v62 = vpop.f32.mrb[44].mxu1 }
 0x254   :  { %v717_v63 = vadd.f32 %v1263_v62, %v1671_v3  ;;  %v708_v1 = vpop.f32.mrb[45].mxu1 }
 0x255   :  { %v709_v2 = vadd.f32 %v1671_v3, %v708_v1  ;;  %v1264_v4 = vpop.f32.mrb[46].mxu1  ;;  %1305 = vmatprep.mubr.bf16.mxu0 %v767_v61 }
 0x256   :  { %v720_v5 = vadd.f32 %v1264_v4, %v1671_v3  ;;  %v711_v6 = vpop.f32.mrb[47].mxu1  ;;  %1306 = vmatmul.mubr.bf16.gmra.mrb[40].mxu0 %v768_v60  ;;  %v753_v8 = vmax.f32 %v717_v63, 0.0 }
 0x257   :  { %v712_v7 = vadd.f32 %v1671_v3, %v711_v6  ;;  %v751_v10 = vmax.f32 %v709_v2, 0.0 }
 0x258   :  { %v754_v9 = vmax.f32 %v720_v5, 0.0 }
 0x259   :  { %v752_v11 = vmax.f32 %v712_v7, 0.0 }
 0x25a   :  { %v770_v12 = vpack.c.bf16 %v754_v9, %v753_v8 }
 0x25b   :  { %v769_v13 = vpack.c.bf16 %v752_v11, %v751_v10 }
 0x25d   :  { %1309 = vmatprep.mubr.bf16.mxu0 %v769_v13 }
 0x25e   :  { %1310 = vmatmul.mubr.bf16.gmra.mrb[44].mxu0 %v770_v12 }
 0x2f9   :  { %v1283_v15 = vpop.f32.mrb[16].mxu0 }
 0x2fa   :  { %v885_v16 = vadd.f32 %v1283_v15, %v1708_v14  ;;  %v876_v17 = vpop.f32.mrb[17].mxu0 }
 0x2fb   :  { %v877_v18 = vadd.f32 %v1708_v14, %v876_v17  ;;  %v1284_v3 = vpop.f32.mrb[18].mxu0 }
 0x2fc   :  { %1005 = vst [vmem:[#allocation10 + $0x10] sm:$0xff] %v885_v16  ;;  %v888_v19 = vadd.f32 %v1284_v3, %v1708_v14  ;;  %v879_v20 = vpop.f32.mrb[19].mxu0 }
 0x2fd   :  { %1003 = vst [vmem:[#allocation10] sm:$0xff] %v877_v18  ;;  %v880_v21 = vadd.f32 %v1708_v14, %v879_v20 }
 0x2fe   :  { %1006 = vst [vmem:[#allocation10 + $0x18] sm:$0xff] %v888_v19 }
 0x2ff   :  { %1004 = vst [vmem:[#allocation10 + $0x8] sm:$0xff] %v880_v21 }
 0x301   :  { %v1287_v22 = vpop.f32.mrb[20].mxu0 }
 0x302   :  { %v901_v23 = vadd.f32 %v1287_v22, %v1708_v14  ;;  %v892_v24 = vpop.f32.mrb[21].mxu0 }
 0x303   :  { %v893_v25 = vadd.f32 %v1708_v14, %v892_v24  ;;  %v1288_v38 = vpop.f32.mrb[22].mxu0 }
 0x304   :  { %1009 = vst [vmem:[#allocation10 + $0x30] sm:$0xff] %v901_v23  ;;  %v904_v26 = vadd.f32 %v1288_v38, %v1708_v14  ;;  %v895_v0 = vpop.f32.mrb[23].mxu0 }
 0x305   :  { %1007 = vst [vmem:[#allocation10 + $0x20] sm:$0xff] %v893_v25  ;;  %v896_v27 = vadd.f32 %v1708_v14, %v895_v0 }
 0x306   :  { %1010 = vst [vmem:[#allocation10 + $0x38] sm:$0xff] %v904_v26 }
 0x307   :  { %1008 = vst [vmem:[#allocation10 + $0x28] sm:$0xff] %v896_v27 }
 0x309   :  { %v1291_v29 = vpop.f32.mrb[24].mxu0 }
 0x30a   :  { %v917_v28 = vadd.f32 %v1291_v29, %v1708_v14  ;;  %v908_v30 = vpop.f32.mrb[25].mxu0 }
 0x30b   :  { %v909_v31 = vadd.f32 %v1708_v14, %v908_v30  ;;  %v1292_v32 = vpop.f32.mrb[26].mxu0 }
 0x30c   :  { %1013 = vst [vmem:[#allocation10 + $0x50] sm:$0xff] %v917_v28  ;;  %v920_v33 = vadd.f32 %v1292_v32, %v1708_v14  ;;  %v911_v34 = vpop.f32.mrb[27].mxu0 }
 0x30d   :  { %1011 = vst [vmem:[#allocation10 + $0x40] sm:$0xff] %v909_v31  ;;  %v912_v35 = vadd.f32 %v1708_v14, %v911_v34 }
 0x30e   :  { %1014 = vst [vmem:[#allocation10 + $0x58] sm:$0xff] %v920_v33 }
 0x30f   :  { %1012 = vst [vmem:[#allocation10 + $0x48] sm:$0xff] %v912_v35 }
 0x311   :  { %v1295_v36 = vpop.f32.mrb[28].mxu0 }
 0x312   :  { %v933_v37 = vadd.f32 %v1295_v36, %v1708_v14  ;;  %v924_v39 = vpop.f32.mrb[29].mxu0 }
 0x313   :  { %v925_v40 = vadd.f32 %v1708_v14, %v924_v39  ;;  %v1296_v41 = vpop.f32.mrb[30].mxu0 }
 0x314   :  { %1017 = vst [vmem:[#allocation10 + $0x70] sm:$0xff] %v933_v37  ;;  %v936_v42 = vadd.f32 %v1296_v41, %v1708_v14  ;;  %v927_v43 = vpop.f32.mrb[31].mxu0 }
 0x315   :  { %1015 = vst [vmem:[#allocation10 + $0x60] sm:$0xff] %v925_v40  ;;  %v928_v44 = vadd.f32 %v1708_v14, %v927_v43 }
 0x316   :  { %1018 = vst [vmem:[#allocation10 + $0x78] sm:$0xff] %v936_v42 }
 0x317   :  { %1016 = vst [vmem:[#allocation10 + $0x68] sm:$0xff] %v928_v44 }
 0x319   :  { %v1299_v45 = vpop.f32.mrb[32].mxu0 }
 0x31a   :  { %v949_v46 = vadd.f32 %v1299_v45, %v1708_v14  ;;  %v940_v47 = vpop.f32.mrb[33].mxu0 }
 0x31b   :  { %v941_v48 = vadd.f32 %v1708_v14, %v940_v47  ;;  %v1300_v49 = vpop.f32.mrb[34].mxu0 }
 0x31c   :  { %1021 = vst [vmem:[#allocation10 + $0x90] sm:$0xff] %v949_v46  ;;  %v952_v50 = vadd.f32 %v1300_v49, %v1708_v14  ;;  %v943_v51 = vpop.f32.mrb[35].mxu0 }
 0x31d   :  { %1019 = vst [vmem:[#allocation10 + $0x80] sm:$0xff] %v941_v48  ;;  %v944_v52 = vadd.f32 %v1708_v14, %v943_v51 }
 0x31e   :  { %1022 = vst [vmem:[#allocation10 + $0x98] sm:$0xff] %v952_v50 }
 0x31f   :  { %1020 = vst [vmem:[#allocation10 + $0x88] sm:$0xff] %v944_v52 }
 0x321   :  { %v1303_v53 = vpop.f32.mrb[36].mxu0 }
 0x322   :  { %v965_v54 = vadd.f32 %v1303_v53, %v1708_v14  ;;  %v956_v55 = vpop.f32.mrb[37].mxu0 }
 0x323   :  { %v957_v56 = vadd.f32 %v1708_v14, %v956_v55  ;;  %v1304_v57 = vpop.f32.mrb[38].mxu0 }
 0x324   :  { %1025 = vst [vmem:[#allocation10 + $0xb0] sm:$0xff] %v965_v54  ;;  %v968_v58 = vadd.f32 %v1304_v57, %v1708_v14  ;;  %v959_v59 = vpop.f32.mrb[39].mxu0 }
 0x325   :  { %1023 = vst [vmem:[#allocation10 + $0xa0] sm:$0xff] %v957_v56  ;;  %v960_v60 = vadd.f32 %v1708_v14, %v959_v59 }
 0x326   :  { %1026 = vst [vmem:[#allocation10 + $0xb8] sm:$0xff] %v968_v58 }
 0x327   :  { %1024 = vst [vmem:[#allocation10 + $0xa8] sm:$0xff] %v960_v60 }
 0x329   :  { %v1307_v61 = vpop.f32.mrb[40].mxu0 }
 0x32a   :  { %v981_v62 = vadd.f32 %v1307_v61, %v1708_v14  ;;  %v972_v63 = vpop.f32.mrb[41].mxu0 }
 0x32b   :  { %v973_v1 = vadd.f32 %v1708_v14, %v972_v63  ;;  %v1308_v2 = vpop.f32.mrb[42].mxu0 }
 0x32c   :  { %1029 = vst [vmem:[#allocation10 + $0xd0] sm:$0xff] %v981_v62  ;;  %v984_v4 = vadd.f32 %v1308_v2, %v1708_v14  ;;  %v975_v5 = vpop.f32.mrb[43].mxu0 }
 0x32d   :  { %1027 = vst [vmem:[#allocation10 + $0xc0] sm:$0xff] %v973_v1  ;;  %v976_v6 = vadd.f32 %v1708_v14, %v975_v5 }
 0x32e   :  { %1030 = vst [vmem:[#allocation10 + $0xd8] sm:$0xff] %v984_v4 }
 0x32f   :  { %1028 = vst [vmem:[#allocation10 + $0xc8] sm:$0xff] %v976_v6 }
 0x331   :  { %v1311_v7 = vpop.f32.mrb[44].mxu0 }
 0x332   :  { %v997_v8 = vadd.f32 %v1311_v7, %v1708_v14  ;;  %v988_v9 = vpop.f32.mrb[45].mxu0 }
 0x333   :  { %v989_v10 = vadd.f32 %v1708_v14, %v988_v9  ;;  %v1312_v11 = vpop.f32.mrb[46].mxu0 }
 0x334   :  { %1033 = vst [vmem:[#allocation10 + $0xf0] sm:$0xff] %v997_v8  ;;  %v1000_v12 = vadd.f32 %v1312_v11, %v1708_v14  ;;  %v991_v13 = vpop.f32.mrb[47].mxu0 }
 0x335   :  { %1031 = vst [vmem:[#allocation10 + $0xe0] sm:$0xff] %v989_v10  ;;  %v992_v15 = vadd.f32 %v1708_v14, %v991_v13 }
 0x336   :  { %1034 = vst [vmem:[#allocation10 + $0xf8] sm:$0xff] %v1000_v12 }
 0x337   :  { %1032 = vst [vmem:[#allocation10 + $0xe8] sm:$0xff] %v992_v15 }
 0x338   :  { %1477 = shalt.err (!%p1474_p8)
}
 0x339   :  { %s1478_s9 = scalar_lea.hbm %s1761_s7, 4096 }
 0x33a   :  { %p1479_p9 = scmp.ne.s32.totalorder %s1761_s7, %s1478_s9  ;;  %p1482_p10 = scmp.lt.u32.totalorder %s1478_s9, %s1761_s7 }
 0x33c   :  { %p1484_p11 = pnand %p1482_p10, %p1479_p9 }
 0x33e   :  { %1487 = shalt.err (!%p1484_p11)
}
 0x33f   :  { %s1503_s16 = smov 128   ;;  %s1504_s0 = smov 8  }
 0x340   :  { %1046 = dma.vmem_to_hbm [thread:$0]  %s1041_s28, 4096, %s1761_s7, [#allocation4], %s1503_s16, %s1503_s16, %s1504_s0  }
 0x341   :  { %1494 = dma.done.wait [#allocation4], 4096  }
 0x342   :  { %1495 = vsyncadd [#allocation4], 4294963200 }
 0x343   :  { %1050 = vsyncpa [#allocation3], 1 }
 0x344   :  { %1051 = vsyncpa [#allocation6], 1 }
 0x345   :  { %1052 = vsyncpa [#allocation9], 1 }
 0x346   :  { %1053 = vsyncpa [#allocation4], 1 }

</bundles_post_ra>
